<compile_context>
chip_gen: v5e
topology: v5e:2x2
jax: 0.10.0
libtpu: 0.0.40
codegen_flags: <defaults>
</compile_context>

<pallas_src>
import functools

import jax
import jax.numpy as jnp
from jax.experimental import pallas as pl
from jax.experimental.pallas import tpu as pltpu


def _round_up(x: int, m: int) -> int:
    return (x + m - 1) // m * m


def _classifier_kernel(x_ref, w1_ref, b1_ref, w2_ref, b2_ref, o_ref, *, mm_dtype):
    # x_ref: (TB, in_feat)   w1_ref: (in_feat, Hp)  b1_ref: (1, Hp)
    # w2_ref: (Hp, Np)       b2_ref: (1, Np)        o_ref: (TB, Np)
    x = x_ref[...].astype(mm_dtype)
    h32 = jnp.dot(x, w1_ref[...].astype(mm_dtype), preferred_element_type=jnp.float32)
    h32 = h32 + b1_ref[...].astype(jnp.float32)
    h = jnp.tanh(h32).astype(mm_dtype)          # tanh in f32, cast back for the MXU
    out = jnp.dot(h, w2_ref[...].astype(mm_dtype), preferred_element_type=jnp.float32)
    out = out + b2_ref[...].astype(jnp.float32)
    o_ref[...] = out.astype(o_ref.dtype)


def _vmem_capacity_bytes() -> int:
    try:
        cap = getattr(pltpu.get_tpu_info(), "vmem_capacity_bytes", None)
        if cap:
            return int(cap)
    except Exception:
        pass
    return 64 << 20  # conservative fallback (v7x per-TC VMEM)


def classifier_forward(x, w1, b1, w2, b2, *, tile_batch=None, use_bf16_matmul=False):
    B, in_feat = x.shape
    hidden = w1.shape[1]
    num_labels = w2.shape[1]
    assert w1.shape == (in_feat, hidden) and w2.shape == (hidden, num_labels)
    dtype = x.dtype
    bytes_x = jnp.dtype(dtype).itemsize
    mm_dtype = jnp.bfloat16 if (use_bf16_matmul and dtype == jnp.float32) else dtype
    mm_bytes = jnp.dtype(mm_dtype).itemsize

    # dtype-aware sublane packing: 8 rows (f32), 16 (bf16), 32 (int8/fp8).
    sub = max(8, 32 // bytes_x)

    # --- lane-pad hidden and num_labels to multiples of 128 (numerically free) ---
    Hp = _round_up(hidden, 128)
    Np = _round_up(num_labels, 128)
    b1 = jnp.reshape(b1, (1, hidden))
    b2 = jnp.reshape(b2, (1, num_labels))
    w1p = jnp.pad(w1, ((0, 0), (0, Hp - hidden))) if Hp != hidden else w1
    b1p = jnp.pad(b1, ((0, 0), (0, Hp - hidden))) if Hp != hidden else b1
    if Hp != hidden or Np != num_labels:
        w2p = jnp.pad(w2, ((0, Hp - hidden), (0, Np - num_labels)))
    else:
        w2p = w2
    b2p = jnp.pad(b2, ((0, 0), (0, Np - num_labels))) if Np != num_labels else b2

    # --- VMEM budget: resident weights (counted double-buffered for safety) +
    #     double-buffered x/out tiles + in-kernel f32 intermediates + scratch margin ---
    vmem_cap = _vmem_capacity_bytes()
    usable = int(vmem_cap * 0.8)                 # ~20% headroom below physical VMEM
    w_bytes = 2 * (w1p.size * w1p.dtype.itemsize + w2p.size * w2p.dtype.itemsize
                   + b1p.size * b1p.dtype.itemsize + b2p.size * b2p.dtype.itemsize)
    per_row = (2 * in_feat * bytes_x             # x tile (double-buffered)
               + 2 * Np * bytes_x                # out tile (double-buffered)
               + Hp * 4 + Hp * mm_bytes          # h32 + h intermediates
               + Np * 4)                         # f32 pre-store intermediate
    scratch_margin = 4 << 20                     # Mosaic internal scratch / slack
    budget = usable - w_bytes - scratch_margin
    max_tile = max(sub, (max(budget, 0) // per_row) // sub * sub)

    io_bytes = B * (in_feat + Np) * bytes_x
    TINY = 4 << 20

    # --- tile selection: biggest tile that fits VMEM; only shrink to keep >=4 steps ---
    if tile_batch is None:
        if io_bytes <= TINY:
            tile_batch = min(_round_up(B, sub), max_tile)   # collapse to one grid step
        else:
            tile_batch = min(max_tile, 1024)
            tile_batch = min(tile_batch, _round_up(pl.cdiv(B, 4), sub))  # >=2/TC on v7x
            tile_batch = max(tile_batch, sub)
    tile_batch = max(sub, _round_up(int(tile_batch), sub))

    if tile_batch >= B:
        # Single grid step: pad rows minimally so the block equals the array.
        Bp = _round_up(B, sub)
        tile_batch = Bp
        xin = jnp.pad(x, ((0, Bp - B), (0, 0))) if Bp != B else x
        grid_b = 1
    else:
        # Multi-step: no HBM copy of x; a ragged last block is clipped by Pallas
        # (safe: each output row depends only on its own x row).
        Bp = B
        xin = x
        grid_b = pl.cdiv(B, tile_batch)

    vmem_needed = w_bytes + tile_batch * per_row + scratch_margin
    vmem_limit = int(min(max(vmem_needed, 32 << 20), usable))

    kernel = functools.partial(_classifier_kernel, mm_dtype=mm_dtype)

    def build(single_buffer_weights):
        wkw = dict(pipeline_mode=pl.Buffered(1)) if single_buffer_weights else {}
        return pl.pallas_call(
            kernel,
            out_shape=jax.ShapeDtypeStruct((Bp, Np), dtype),
            grid_spec=pltpu.PrefetchScalarGridSpec(
                num_scalar_prefetch=0,
                grid=(grid_b,),
                in_specs=[
                    # x tile: streamed over the batch, default double-buffering.
                    pl.BlockSpec((tile_batch, in_feat), lambda i: (i, 0)),
                    # Resident weights / biases: constant index_map.
                    pl.BlockSpec((in_feat, Hp), lambda i: (0, 0), **wkw),
                    pl.BlockSpec((1, Hp), lambda i: (0, 0), **wkw),
                    pl.BlockSpec((Hp, Np), lambda i: (0, 0), **wkw),
                    pl.BlockSpec((1, Np), lambda i: (0, 0), **wkw),
                ],
                out_specs=pl.BlockSpec((tile_batch, Np), lambda i: (i, 0)),
            ),
            compiler_params=pltpu.CompilerParams(
                dimension_semantics=("parallel",) if grid_b > 1 else ("arbitrary",),
                vmem_limit_bytes=vmem_limit,
            ),
        )

    try:
        out = build(True)(xin, w1p, b1p, w2p, b2p)
    except Exception:
        # Fallback: default buffering (constant index_map => weights still DMA'd once).
        out = build(False)(xin, w1p, b1p, w2p, b2p)

    # Strip row + label padding.
    return out[:B, :num_labels]


def init_classifier_params(key, in_feat, num_labels, dtype=jnp.float32):
    # Deterministic init mimicking nn.Linear defaults (uniform +/- 1/sqrt(fan_in)).
    hidden = in_feat // 2
    k1, k2, k3, k4 = jax.random.split(key, 4)
    lim1 = 1.0 / jnp.sqrt(jnp.asarray(in_feat, jnp.float32))
    lim2 = 1.0 / jnp.sqrt(jnp.asarray(hidden, jnp.float32))
    # Stored as [in, out] (transpose of PyTorch's [out, in] weight).
    w1 = jax.random.uniform(k1, (in_feat, hidden), dtype, -lim1, lim1)
    b1 = jax.random.uniform(k2, (1, hidden), dtype, -lim1, lim1)
    w2 = jax.random.uniform(k3, (hidden, num_labels), dtype, -lim2, lim2)
    b2 = jax.random.uniform(k4, (1, num_labels), dtype, -lim2, lim2)
    return w1, b1, w2, b2


def _reference(x, w1, b1, w2, b2):
    hp = jax.lax.Precision.HIGHEST
    f32 = jnp.float32
    h = jnp.tanh(jnp.dot(x.astype(f32), w1.astype(f32), precision=hp)
                 + b1.astype(f32).reshape(1, -1))
    o = (jnp.dot(h, w2.astype(f32), precision=hp) + b2.astype(f32).reshape(1, -1))
    return o.astype(x.dtype)


if __name__ == "__main__":
    key = jax.random.PRNGKey(0)
    kx1, kp1, kx2, kp2, kx3, kp3 = jax.random.split(key, 6)
    # Tolerance allows for MXU multi-pass f32 decomposition vs HIGHEST-precision ref.
    tol = dict(atol=5e-4, rtol=5e-4)

    # Case 1: single-step grid (whole small batch in one lane-dense tile).
    batch, in_feat, num_labels = 256, 64, 4
    x = jax.random.normal(kx1, (batch, in_feat), jnp.float32)
    w1, b1, w2, b2 = init_classifier_params(kp1, in_feat, num_labels)
    out = jax.block_until_ready(classifier_forward(x, w1, b1, w2, b2))
    ref = _reference(x, w1, b1, w2, b2)
    assert out.shape == (batch, num_labels)
    assert jnp.allclose(out, ref, **tol)

    # Case 2: ragged tiny batch + non-128 label dim (exercises padding path).
    batch2, in_feat2, num_labels2 = 10, 32, 3
    x2 = jax.random.normal(kx2, (batch2, in_feat2), jnp.float32)
    w1b, b1b, w2b, b2b = init_classifier_params(kp2, in_feat2, num_labels2)
    out2 = jax.block_until_ready(classifier_forward(x2, w1b, b1b, w2b, b2b))
    ref2 = _reference(x2, w1b, b1b, w2b, b2b)
    assert out2.shape == (batch2, num_labels2)
    assert jnp.allclose(out2, ref2, **tol)

    # Case 3: explicit multi-step pipelined grid ("parallel" batch axis).
    batch3, in_feat3, num_labels3 = 96, 64, 4
    x3 = jax.random.normal(kx3, (batch3, in_feat3), jnp.float32)
    w1c, b1c, w2c, b2c = init_classifier_params(kp3, in_feat3, num_labels3)
    out3 = jax.block_until_ready(
        classifier_forward(x3, w1c, b1c, w2c, b2c, tile_batch=32))
    ref3 = _reference(x3, w1c, b1c, w2c, b2c)
    assert out3.shape == (batch3, num_labels3)
    assert jnp.allclose(out3, ref3, **tol)

    print("KERNEL_OK")
</pallas_src>

<mosaic_0001>
module attributes {stable_mosaic.version = 11 : i64} {
  func.func @_classifier_kernel(%arg0: i32, %arg1: memref<256x64xf32, #tpu.memory_space<vmem>>, %arg2: memref<64x128xf32, #tpu.memory_space<vmem>>, %arg3: memref<1x128xf32, #tpu.memory_space<vmem>>, %arg4: memref<128x128xf32, #tpu.memory_space<vmem>>, %arg5: memref<1x128xf32, #tpu.memory_space<vmem>>, %arg6: memref<256x128xf32, #tpu.memory_space<vmem>>) attributes {dimension_semantics = [#tpu.dimension_semantics<arbitrary>], iteration_bounds = array<i64: 1>, scalar_prefetch = 0 : i64, scratch_operands = 0 : i64, tpu.core_type = #tpu.core_type<tc>, window_params = [{transform_indices = @transform_0, window_bounds = array<i64: 256, 64>}, {pipeline_mode = #tpu.pipeline_mode<synchronous>, transform_indices = @transform_1, window_bounds = array<i64: 64, 128>}, {pipeline_mode = #tpu.pipeline_mode<synchronous>, transform_indices = @transform_2, window_bounds = array<i64: 1, 128>}, {pipeline_mode = #tpu.pipeline_mode<synchronous>, transform_indices = @transform_3, window_bounds = array<i64: 128, 128>}, {pipeline_mode = #tpu.pipeline_mode<synchronous>, transform_indices = @transform_4, window_bounds = array<i64: 1, 128>}, {transform_indices = @transform_5, window_bounds = array<i64: 256, 128>}]} {
    %c0 = arith.constant 0 : index
    %c0_0 = arith.constant 0 : index
    %0 = vector.load %arg1[%c0, %c0_0] : memref<256x64xf32, #tpu.memory_space<vmem>>, vector<256x64xf32>
    %c0_1 = arith.constant 0 : index
    %c0_2 = arith.constant 0 : index
    %1 = vector.load %arg2[%c0_1, %c0_2] : memref<64x128xf32, #tpu.memory_space<vmem>>, vector<64x128xf32>
    %cst = arith.constant dense<0.000000e+00> : vector<256x128xf32>
    %2 = tpu.matmul %0, %1, %cst {dimension_numbers = #tpu.dot_dimension_numbers<[1], [0], [0], [1], [0, 0, 1, 1], [], []>} : vector<256x64xf32>, vector<64x128xf32>, vector<256x128xf32> -> vector<256x128xf32>
    %c0_3 = arith.constant 0 : index
    %c0_4 = arith.constant 0 : index
    %3 = vector.load %arg3[%c0_3, %c0_4] : memref<1x128xf32, #tpu.memory_space<vmem>>, vector<1x128xf32>
    %4 = vector.broadcast %3 : vector<1x128xf32> to vector<256x128xf32>
    %5 = arith.addf %2, %4 : vector<256x128xf32>
    %6 = math.tanh %5 : vector<256x128xf32>
    %c0_5 = arith.constant 0 : index
    %c0_6 = arith.constant 0 : index
    %7 = vector.load %arg4[%c0_5, %c0_6] : memref<128x128xf32, #tpu.memory_space<vmem>>, vector<128x128xf32>
    %cst_7 = arith.constant dense<0.000000e+00> : vector<256x128xf32>
    %8 = tpu.matmul %6, %7, %cst_7 {dimension_numbers = #tpu.dot_dimension_numbers<[1], [0], [0], [1], [0, 0, 1, 1], [], []>} : vector<256x128xf32>, vector<128x128xf32>, vector<256x128xf32> -> vector<256x128xf32>
    %c0_8 = arith.constant 0 : index
    %c0_9 = arith.constant 0 : index
    %9 = vector.load %arg5[%c0_8, %c0_9] : memref<1x128xf32, #tpu.memory_space<vmem>>, vector<1x128xf32>
    %10 = vector.broadcast %9 : vector<1x128xf32> to vector<256x128xf32>
    %11 = arith.addf %8, %10 : vector<256x128xf32>
    %c0_10 = arith.constant 0 : index
    %c0_11 = arith.constant 0 : index
    %12 = vector.load %arg6[%c0_10, %c0_11] : memref<256x128xf32, #tpu.memory_space<vmem>>, vector<256x128xf32>
    tpu.vector_store %arg6[%c0_10, %c0_11], %11 {strides = array<i32>} : memref<256x128xf32, #tpu.memory_space<vmem>>, vector<256x128xf32>,
    return
  }
  func.func @transform_0(%arg0: i32) -> (i32, i32) {
    %c0_i32 = arith.constant 0 : i32
    %c0_i32_0 = arith.constant 0 : i32
    return %arg0, %c0_i32 : i32, i32
  }
  func.func @transform_1(%arg0: i32) -> (i32, i32) {
    %c0_i32 = arith.constant 0 : i32
    %c0_i32_0 = arith.constant 0 : i32
    %c0_i32_1 = arith.constant 0 : i32
    return %c0_i32, %c0_i32_0 : i32, i32
  }
  func.func @transform_2(%arg0: i32) -> (i32, i32) {
    %c0_i32 = arith.constant 0 : i32
    %c0_i32_0 = arith.constant 0 : i32
    %c0_i32_1 = arith.constant 0 : i32
    return %c0_i32, %c0_i32_0 : i32, i32
  }
  func.func @transform_3(%arg0: i32) -> (i32, i32) {
    %c0_i32 = arith.constant 0 : i32
    %c0_i32_0 = arith.constant 0 : i32
    %c0_i32_1 = arith.constant 0 : i32
    return %c0_i32, %c0_i32_0 : i32, i32
  }
  func.func @transform_4(%arg0: i32) -> (i32, i32) {
    %c0_i32 = arith.constant 0 : i32
    %c0_i32_0 = arith.constant 0 : i32
    %c0_i32_1 = arith.constant 0 : i32
    return %c0_i32, %c0_i32_0 : i32, i32
  }
  func.func @transform_5(%arg0: i32) -> (i32, i32) {
    %c0_i32 = arith.constant 0 : i32
    %c0_i32_0 = arith.constant 0 : i32
    return %arg0, %c0_i32 : i32, i32
  }
}

module attributes {stable_mosaic.version = 11 : i64} {
  func.func @_classifier_kernel(%arg0: i32, %arg1: memref<256x64xf32, #tpu.memory_space<vmem>>, %arg2: memref<64x128xf32, #tpu.memory_space<vmem>>, %arg3: memref<1x128xf32, #tpu.memory_space<vmem>>, %arg4: memref<128x128xf32, #tpu.memory_space<vmem>>, %arg5: memref<1x128xf32, #tpu.memory_space<vmem>>, %arg6: memref<256x128xf32, #tpu.memory_space<vmem>>) attributes {dimension_semantics = [#tpu.dimension_semantics<arbitrary>], iteration_bounds = array<i64: 1>, scalar_prefetch = 0 : i64, scratch_operands = 0 : i64, tpu.core_type = #tpu.core_type<tc>, window_params = [{transform_indices = @transform_0, window_bounds = array<i64: 256, 64>}, {pipeline_mode = #tpu.pipeline_mode<synchronous>, transform_indices = @transform_1, window_bounds = array<i64: 64, 128>}, {pipeline_mode = #tpu.pipeline_mode<synchronous>, transform_indices = @transform_2, window_bounds = array<i64: 1, 128>}, {pipeline_mode = #tpu.pipeline_mode<synchronous>, transform_indices = @transform_3, window_bounds = array<i64: 128, 128>}, {pipeline_mode = #tpu.pipeline_mode<synchronous>, transform_indices = @transform_4, window_bounds = array<i64: 1, 128>}, {transform_indices = @transform_5, window_bounds = array<i64: 256, 128>}]} {
    %c0 = arith.constant 0 : index
    %c0_0 = arith.constant 0 : index
    %0 = vector.load %arg1[%c0, %c0_0] : memref<256x64xf32, #tpu.memory_space<vmem>>, vector<256x64xf32>
    %c0_1 = arith.constant 0 : index
    %c0_2 = arith.constant 0 : index
    %1 = vector.load %arg2[%c0_1, %c0_2] : memref<64x128xf32, #tpu.memory_space<vmem>>, vector<64x128xf32>
    %cst = arith.constant dense<0.000000e+00> : vector<256x128xf32>
    %2 = tpu.matmul %0, %1, %cst {dimension_numbers = #tpu.dot_dimension_numbers<[1], [0], [0], [1], [0, 0, 1, 1], [], []>} : vector<256x64xf32>, vector<64x128xf32>, vector<256x128xf32> -> vector<256x128xf32>
    %c0_3 = arith.constant 0 : index
    %c0_4 = arith.constant 0 : index
    %3 = vector.load %arg3[%c0_3, %c0_4] : memref<1x128xf32, #tpu.memory_space<vmem>>, vector<1x128xf32>
    %4 = vector.broadcast %3 : vector<1x128xf32> to vector<256x128xf32>
    %5 = arith.addf %2, %4 : vector<256x128xf32>
    %6 = math.tanh %5 : vector<256x128xf32>
    %c0_5 = arith.constant 0 : index
    %c0_6 = arith.constant 0 : index
    %7 = vector.load %arg4[%c0_5, %c0_6] : memref<128x128xf32, #tpu.memory_space<vmem>>, vector<128x128xf32>
    %cst_7 = arith.constant dense<0.000000e+00> : vector<256x128xf32>
    %8 = tpu.matmul %6, %7, %cst_7 {dimension_numbers = #tpu.dot_dimension_numbers<[1], [0], [0], [1], [0, 0, 1, 1], [], []>} : vector<256x128xf32>, vector<128x128xf32>, vector<256x128xf32> -> vector<256x128xf32>
    %c0_8 = arith.constant 0 : index
    %c0_9 = arith.constant 0 : index
    %9 = vector.load %arg5[%c0_8, %c0_9] : memref<1x128xf32, #tpu.memory_space<vmem>>, vector<1x128xf32>
    %10 = vector.broadcast %9 : vector<1x128xf32> to vector<256x128xf32>
    %11 = arith.addf %8, %10 : vector<256x128xf32>
    %c0_10 = arith.constant 0 : index
    %c0_11 = arith.constant 0 : index
    %12 = vector.load %arg6[%c0_10, %c0_11] : memref<256x128xf32, #tpu.memory_space<vmem>>, vector<256x128xf32>
    tpu.vector_store %arg6[%c0_10, %c0_11], %11 {strides = array<i32>} : memref<256x128xf32, #tpu.memory_space<vmem>>, vector<256x128xf32>,
    return
  }
  func.func @transform_0(%arg0: i32) -> (i32, i32) {
    %c0_i32 = arith.constant 0 : i32
    %c0_i32_0 = arith.constant 0 : i32
    return %arg0, %c0_i32 : i32, i32
  }
  func.func @transform_1(%arg0: i32) -> (i32, i32) {
    %c0_i32 = arith.constant 0 : i32
    %c0_i32_0 = arith.constant 0 : i32
    %c0_i32_1 = arith.constant 0 : i32
    return %c0_i32, %c0_i32_0 : i32, i32
  }
  func.func @transform_2(%arg0: i32) -> (i32, i32) {
    %c0_i32 = arith.constant 0 : i32
    %c0_i32_0 = arith.constant 0 : i32
    %c0_i32_1 = arith.constant 0 : i32
    return %c0_i32, %c0_i32_0 : i32, i32
  }
  func.func @transform_3(%arg0: i32) -> (i32, i32) {
    %c0_i32 = arith.constant 0 : i32
    %c0_i32_0 = arith.constant 0 : i32
    %c0_i32_1 = arith.constant 0 : i32
    return %c0_i32, %c0_i32_0 : i32, i32
  }
  func.func @transform_4(%arg0: i32) -> (i32, i32) {
    %c0_i32 = arith.constant 0 : i32
    %c0_i32_0 = arith.constant 0 : i32
    %c0_i32_1 = arith.constant 0 : i32
    return %c0_i32, %c0_i32_0 : i32, i32
  }
  func.func @transform_5(%arg0: i32) -> (i32, i32) {
    %c0_i32 = arith.constant 0 : i32
    %c0_i32_0 = arith.constant 0 : i32
    return %arg0, %c0_i32 : i32, i32
  }
}

</mosaic_0001>

<bundles_post_ra>
// kernel: tpu_custom_call.1
= control target key start
LH: loop header
LB: loop body
LE: loop exit
PB: predicated region body
PF: predicated region fallthrough
CT: control target
= control target key end

     0   :  { %s967_s0 = inlined_call_operand.vmem [shape: f32[256,64], index: 0, kind: input, shape index: {}]   ;;  %s968_s1 = inlined_call_operand.vmem [shape: f32[64,128], index: 1, kind: input, shape index: {}]   ;;  %s969_s2 = inlined_call_operand.vmem [shape: f32[1,128], index: 2, kind: input, shape index: {}]   ;;  %s970_s3 = inlined_call_operand.vmem [shape: f32[128,128], index: 3, kind: input, shape index: {}]   ;;  %s971_s4 = inlined_call_operand.vmem [shape: f32[1,128], index: 4, kind: input, shape index: {}]   ;;  %s972_s5 = inlined_call_operand.hbm [shape: f32[256,128], index: 5, kind: output, shape index: {}]  }
   0x1   :  { %v60_v0 = vld [vmem:[%s968_s1 + $0x38] sm:$0xff]  ;;  %v59_v1 = vld [vmem:[%s968_s1 + $0x30] sm:$0xff]  ;;  %v58_v2 = vld [vmem:[%s968_s1 + $0x28] sm:$0xff] }
   0x2   :  { %170 = vmatpush.msra.mxu0 %v60_v0  ;;  %522 = vmatpush.msra.mxu3 %v60_v0  ;;  %v57_v3 = vld [vmem:[%s968_s1 + $0x20] sm:$0xff] }
   0x4   :  { %171 = vmatpush.msra.mxu0 %v59_v1  ;;  %523 = vmatpush.msra.mxu3 %v59_v1 }
   0x5   :  { %10 = vsyncpa [#allocation3], 0  ;;  %v56_v4 = vld [vmem:[%s968_s1 + $0x18] sm:$0xff]  ;;  %v55_v5 = vld [vmem:[%s968_s1 + $0x10] sm:$0xff]  ;;  %vm65_vm0 = vcmask 523264   ;;  %s478_s29 = sshll.u32 %s972_s5, 4  ;;  %s479_s29 = int_to_ptr.hbm [resolvable:$true] %s478_s29 }
   0x6   :  { %172 = vmatpush.msra.mxu0 %v58_v2  ;;  %524 = vmatpush.msra.mxu3 %v58_v2  ;;  %v54_v6 = vld [vmem:[%s968_s1 + $0x8] sm:$0xff]  ;;  %v53_v7 = vld [vmem:[%s968_s1] sm:$0xff]  ;;  %v23_v10 = vld [vmem:[%s967_s0 + $0x10] sm:$0xff]  ;;  %s658_s30 = smov 128   ;;  %s659_s6 = smov 8  }
   0x7   :  { %v21_v8 = vld [vmem:[%s967_s0] sm:$0xff]  ;;  %v22_v9 = vld [vmem:[%s967_s0 + $0x8] sm:$0xff]  ;;  %v24_v11 = vld [vmem:[%s967_s0 + $0x18] sm:$0xff] }
   0x8   :  { %173 = vmatpush.msra.mxu0 %v57_v3  ;;  %525 = vmatpush.msra.mxu3 %v57_v3  ;;  %v25_v12 = vld [vmem:[%s967_s0 + $0x20] sm:$0xff]  ;;  %v26_v13 = vld [vmem:[%s967_s0 + $0x28] sm:$0xff]  ;;  %v27_v14 = vld [vmem:[%s967_s0 + $0x30] sm:$0xff] }
   0x9   :  { %v28_v15 = vld [vmem:[%s967_s0 + $0x38] sm:$0xff]  ;;  %v29_v16 = vld [vmem:[%s967_s0 + $0x40] sm:$0xff]  ;;  %v30_v17 = vld [vmem:[%s967_s0 + $0x48] sm:$0xff] }
   0xa   :  { %174 = vmatpush.msra.mxu0 %v56_v4  ;;  %526 = vmatpush.msra.mxu3 %v56_v4  ;;  %v322_v18 = vld [vmem:[%s970_s3 + $0x78] sm:$0xff]  ;;  %v321_v19 = vld [vmem:[%s970_s3 + $0x70] sm:$0xff]  ;;  %v320_v20 = vld [vmem:[%s970_s3 + $0x68] sm:$0xff] }
   0xb   :  { %327 = vmatpush.msra.mxu1 %v322_v18  ;;  %530 = vmatpush.msra.mxu2 %v322_v18  ;;  %v319_v21 = vld [vmem:[%s970_s3 + $0x60] sm:$0xff]  ;;  %v31_v22 = vld [vmem:[%s967_s0 + $0x50] sm:$0xff]  ;;  %v318_v23 = vld [vmem:[%s970_s3 + $0x58] sm:$0xff] }
   0xc   :  { %175 = vmatpush.msra.mxu0 %v55_v5  ;;  %527 = vmatpush.msra.mxu3 %v55_v5  ;;  %v38_v24 = vld [vmem:[%s967_s0 + $0x88] sm:$0xff]  ;;  %v317_v25 = vld [vmem:[%s970_s3 + $0x50] sm:$0xff]  ;;  %v315_v27 = vld [vmem:[%s970_s3 + $0x40] sm:$0xff] }
   0xd   :  { %328 = vmatpush.msra.mxu1 %v321_v19  ;;  %532 = vmatpush.msra.mxu2 %v321_v19  ;;  %v316_v26 = vld [vmem:[%s970_s3 + $0x48] sm:$0xff]  ;;  %v32_v28 = vld [vmem:[%s967_s0 + $0x58] sm:$0xff]  ;;  %v39_v30 = vld [vmem:[%s967_s0 + $0x90] sm:$0xff] }
   0xe   :  { %176 = vmatpush.msra.mxu0 %v54_v6  ;;  %528 = vmatpush.msra.mxu3 %v54_v6  ;;  %v314_v29 = vld [vmem:[%s970_s3 + $0x38] sm:$0xff]  ;;  %v313_v31 = vld [vmem:[%s970_s3 + $0x30] sm:$0xff]  ;;  %v312_v32 = vld [vmem:[%s970_s3 + $0x28] sm:$0xff] }
   0xf   :  { %329 = vmatpush.msra.mxu1 %v320_v20  ;;  %534 = vmatpush.msra.mxu2 %v320_v20  ;;  %v33_v33 = vld [vmem:[%s967_s0 + $0x60] sm:$0xff]  ;;  %v310_v35 = vld [vmem:[%s970_s3 + $0x18] sm:$0xff]  ;;  %v309_v37 = vld [vmem:[%s970_s3 + $0x10] sm:$0xff] }
  0x10   :  { %177 = vmatpush.msra.mxu0 %v53_v7  ;;  %529 = vmatpush.msra.mxu3 %v53_v7  ;;  %v311_v34 = vld [vmem:[%s970_s3 + $0x20] sm:$0xff]  ;;  %v40_v36 = vld [vmem:[%s967_s0 + $0x98] sm:$0xff]  ;;  %v308_v38 = vld [vmem:[%s970_s3 + $0x8] sm:$0xff] }
  0x11   :  { %490 = vmatmul.msk.f32.vlgmr.msra.gmra.mxu0 %vm65_vm0, %v21_v8  ;;  %330 = vmatpush.msra.mxu1 %v319_v21  ;;  %v34_v39 = vld [vmem:[%s967_s0 + $0x68] sm:$0xff]  ;;  %v307_v40 = vld [vmem:[%s970_s3] sm:$0xff]  ;;  %v35_v42 = vld [vmem:[%s967_s0 + $0x70] sm:$0xff] }
  0x12   :  { %531 = vmatpush.msrb.mxu3 %v322_v18  ;;  %536 = vmatpush.msra.mxu2 %v319_v21  ;;  %v41_v41 = vld [vmem:[%s967_s0 + $0xa0] sm:$0xff]  ;;  %v42_v43 = vld [vmem:[%s967_s0 + $0xa8] sm:$0xff]  ;;  %v36_v44 = vld [vmem:[%s967_s0 + $0x78] sm:$0xff] }
  0x13   :  { %331 = vmatpush.msra.mxu1 %v318_v23  ;;  %507 = vmatmul.msk.f32.vlgmr.msra.gmra.mxu3 %vm65_vm0, %v38_v24  ;;  %v43_v45 = vld [vmem:[%s967_s0 + $0xb0] sm:$0xff]  ;;  %v853_v46 = vld [vmem:[%s969_s2] ss:$0 sm:$0xff]  ;;  %v44_v50 = vld [vmem:[%s967_s0 + $0xb8] sm:$0xff] }
  0x14   :  { %533 = vmatpush.msrb.mxu3 %v321_v19  ;;  %538 = vmatpush.msra.mxu2 %v318_v23  ;;  %v37_v48 = vld [vmem:[%s967_s0 + $0x80] sm:$0xff]  ;;  %v46_v58 = vld [vmem:[%s967_s0 + $0xc8] sm:$0xff]  ;;  %v47_v62 = vld [vmem:[%s967_s0 + $0xd0] sm:$0xff] }
  0x15   :  { %332 = vmatpush.msra.mxu1 %v317_v25  ;;  %v45_v54 = vld [vmem:[%s967_s0 + $0xc0] sm:$0xff]  ;;  %v48_v2 = vld [vmem:[%s967_s0 + $0xd8] sm:$0xff] }
  0x16   :  { %535 = vmatpush.msrb.mxu3 %v320_v20  ;;  %540 = vmatpush.msra.mxu2 %v317_v25  ;;  %v49_v6 = vld [vmem:[%s967_s0 + $0xe0] sm:$0xff]  ;;  %v52_v18 = vld [vmem:[%s967_s0 + $0xf8] sm:$0xff] }
  0x17   :  { %333 = vmatpush.msra.mxu1 %v316_v26 }
  0x18   :  { %537 = vmatpush.msrb.mxu3 %v319_v21  ;;  %542 = vmatpush.msra.mxu2 %v316_v26 }
  0x19   :  { %491 = vmatmul.msk.f32.gmra.mxu0 %vm65_vm0, %v22_v9  ;;  %334 = vmatpush.msra.mxu1 %v315_v27 }
  0x1a   :  { %539 = vmatpush.msrb.mxu3 %v318_v23  ;;  %544 = vmatpush.msra.mxu2 %v315_v27 }
  0x1b   :  { %335 = vmatpush.msra.mxu1 %v314_v29  ;;  %508 = vmatmul.msk.f32.gmra.mxu3 %vm65_vm0, %v39_v30 }
  0x1c   :  { %541 = vmatpush.msrb.mxu3 %v317_v25  ;;  %546 = vmatpush.msra.mxu2 %v314_v29 }
  0x1d   :  { %336 = vmatpush.msra.mxu1 %v313_v31 }
  0x1e   :  { %543 = vmatpush.msrb.mxu3 %v316_v26  ;;  %548 = vmatpush.msra.mxu2 %v313_v31 }
  0x1f   :  { %337 = vmatpush.msra.mxu1 %v312_v32 }
  0x20   :  { %545 = vmatpush.msrb.mxu3 %v315_v27  ;;  %550 = vmatpush.msra.mxu2 %v312_v32 }
  0x21   :  { %492 = vmatmul.msk.f32.gmra.mxu0 %vm65_vm0, %v23_v10  ;;  %338 = vmatpush.msra.mxu1 %v311_v34  ;;  %v50_v10 = vld [vmem:[%s967_s0 + $0xe8] sm:$0xff] }
  0x22   :  { %547 = vmatpush.msrb.mxu3 %v314_v29  ;;  %552 = vmatpush.msra.mxu2 %v311_v34 }
  0x23   :  { %339 = vmatpush.msra.mxu1 %v310_v35  ;;  %509 = vmatmul.msk.f32.gmra.mxu3 %vm65_vm0, %v40_v36 }
  0x24   :  { %549 = vmatpush.msrb.mxu3 %v313_v31  ;;  %554 = vmatpush.msra.mxu2 %v310_v35 }
  0x25   :  { %340 = vmatpush.msra.mxu1 %v309_v37 }
  0x26   :  { %551 = vmatpush.msrb.mxu3 %v312_v32  ;;  %556 = vmatpush.msra.mxu2 %v309_v37 }
  0x27   :  { %341 = vmatpush.msra.mxu1 %v308_v38 }
  0x28   :  { %553 = vmatpush.msrb.mxu3 %v311_v34  ;;  %558 = vmatpush.msra.mxu2 %v308_v38 }
  0x29   :  { %493 = vmatmul.msk.f32.gmra.mxu0 %vm65_vm0, %v24_v11  ;;  %342 = vmatpush.msra.mxu1 %v307_v40 }
  0x2a   :  { %555 = vmatpush.msrb.mxu3 %v310_v35  ;;  %560 = vmatpush.msra.mxu2 %v307_v40 }
  0x2b   :  { %510 = vmatmul.msk.f32.gmra.mxu3 %vm65_vm0, %v41_v41 }
  0x2c   :  { %557 = vmatpush.msrb.mxu3 %v309_v37 }
  0x2e   :  { %559 = vmatpush.msrb.mxu3 %v308_v38 }
  0x30   :  { %561 = vmatpush.msrb.mxu3 %v307_v40 }
  0x31   :  { %494 = vmatmul.msk.f32.gmra.mxu0 %vm65_vm0, %v25_v12 }
  0x33   :  { %511 = vmatmul.msk.f32.gmra.mxu3 %vm65_vm0, %v42_v43 }
  0x39   :  { %495 = vmatmul.msk.f32.gmra.mxu0 %vm65_vm0, %v26_v13 }
  0x3b   :  { %512 = vmatmul.msk.f32.gmra.mxu3 %vm65_vm0, %v43_v45 }
  0x41   :  { %496 = vmatmul.msk.f32.gmra.mxu0 %vm65_vm0, %v27_v14  ;;  %v51_v14 = vld [vmem:[%s967_s0 + $0xf0] sm:$0xff] }
  0x43   :  { %513 = vmatmul.msk.f32.gmra.mxu3 %vm65_vm0, %v44_v50  ;;  %v915_v50 = vld [vmem:[%s971_s4] ss:$0 sm:$0xff]  ;;  %s657_s4 = smov [#allocation2]  }
  0x44   :  { %s476_s26 = sshll.u32 %s657_s4, 4  ;;  %s477_s26 = int_to_ptr.vmem [resolvable:$true] %s476_s26 }
  0x49   :  { %497 = vmatmul.msk.f32.gmra.mxu0 %vm65_vm0, %v28_v15 }
  0x4b   :  { %514 = vmatmul.msk.f32.gmra.mxu3 %vm65_vm0, %v45_v54 }
  0x51   :  { %498 = vmatmul.msk.f32.gmra.mxu0 %vm65_vm0, %v29_v16 }
  0x53   :  { %515 = vmatmul.msk.f32.gmra.mxu3 %vm65_vm0, %v46_v58 }
  0x59   :  { %499 = vmatmul.msk.f32.gmra.mxu0 %vm65_vm0, %v30_v17 }
  0x5b   :  { %516 = vmatmul.msk.f32.gmra.mxu3 %vm65_vm0, %v47_v62 }
  0x61   :  { %500 = vmatmul.msk.f32.gmra.mxu0 %vm65_vm0, %v31_v22 }
  0x63   :  { %517 = vmatmul.msk.f32.gmra.mxu3 %vm65_vm0, %v48_v2 }
  0x69   :  { %501 = vmatmul.msk.f32.gmra.mxu0 %vm65_vm0, %v32_v28 }
  0x6b   :  { %518 = vmatmul.msk.f32.gmra.mxu3 %vm65_vm0, %v49_v6 }
  0x71   :  { %502 = vmatmul.msk.f32.gmra.mxu0 %vm65_vm0, %v33_v33 }
  0x73   :  { %519 = vmatmul.msk.f32.gmra.mxu3 %vm65_vm0, %v50_v10 }
  0x79   :  { %503 = vmatmul.msk.f32.gmra.mxu0 %vm65_vm0, %v34_v39 }
  0x7b   :  { %520 = vmatmul.msk.f32.gmra.mxu3 %vm65_vm0, %v51_v14 }
  0x81   :  { %504 = vmatmul.msk.f32.gmra.mxu0 %vm65_vm0, %v35_v42 }
  0x83   :  { %521 = vmatmul.msk.f32.gmra.mxu3 %vm65_vm0, %v52_v18 }
  0x89   :  { %505 = vmatmul.msk.f32.gmra.mxu0 %vm65_vm0, %v36_v44 }
  0x8e   :  { %v179_v47 = vpop.f32.mrf.mxu0 }
  0x8f   :  { %v180_v49 = vadd.f32 %v853_v46, %v179_v47 }
  0x91   :  { %567 = vtanh.f32 %v180_v49  ;;  %506 = vmatmul.msk.f32.gmra.mxu0 %vm65_vm0, %v37_v48 }
  0x96   :  { %v182_v51 = vpop.f32.mrf.mxu0  ;;  %v230_v26 = vpop.f32.mrf.mxu3 }
  0x97   :  { %v568_v52 = vpop.eup %567  ;;  %v183_v53 = vadd.f32 %v853_v46, %v182_v51  ;;  %v231_v51 = vadd.f32 %v853_v46, %v230_v26 }
  0x98   :  { %343 = vmatmul.f32.vlgmr.msra.gmra.mxu1 %v568_v52 }
  0x99   :  { %569 = vtanh.f32 %v183_v53 }
  0x9e   :  { %v185_v55 = vpop.f32.mrf.mxu0  ;;  %v233_v30 = vpop.f32.mrf.mxu3 }
  0x9f   :  { %v570_v56 = vpop.eup %569  ;;  %v186_v57 = vadd.f32 %v853_v46, %v185_v55 }
  0xa0   :  { %346 = vmatmul.f32.gmra.mxu1 %v570_v56  ;;  %v234_v56 = vadd.f32 %v853_v46, %v233_v30 }
  0xa1   :  { %571 = vtanh.f32 %v186_v57 }
  0xa6   :  { %v188_v59 = vpop.f32.mrf.mxu0  ;;  %v236_v34 = vpop.f32.mrf.mxu3 }
  0xa7   :  { %v572_v60 = vpop.eup %571  ;;  %v189_v61 = vadd.f32 %v853_v46, %v188_v59 }
  0xa8   :  { %349 = vmatmul.f32.gmra.mxu1 %v572_v60 }
  0xa9   :  { %573 = vtanh.f32 %v189_v61  ;;  %v237_v61 = vadd.f32 %v853_v46, %v236_v34 }
  0xae   :  { %v191_v63 = vpop.f32.mrf.mxu0  ;;  %v239_v38 = vpop.f32.mrf.mxu3 }
  0xaf   :  { %v574_v0 = vpop.eup %573  ;;  %v192_v1 = vadd.f32 %v853_v46, %v191_v63  ;;  %v240_v2 = vadd.f32 %v853_v46, %v239_v38 }
  0xb0   :  { %352 = vmatmul.f32.gmra.mxu1 %v574_v0 }
  0xb1   :  { %575 = vtanh.f32 %v192_v1 }
  0xb6   :  { %v194_v3 = vpop.f32.mrf.mxu0  ;;  %v242_v42 = vpop.f32.mrf.mxu3 }
  0xb7   :  { %v576_v4 = vpop.eup %575  ;;  %v195_v5 = vadd.f32 %v853_v46, %v194_v3 }
  0xb8   :  { %355 = vmatmul.f32.gmra.mxu1 %v576_v4 }
  0xb9   :  { %577 = vtanh.f32 %v195_v5 }
  0xbe   :  { %v197_v7 = vpop.f32.mrf.mxu0  ;;  %v245_v47 = vpop.f32.mrf.mxu3 }
  0xbf   :  { %v578_v8 = vpop.eup %577  ;;  %v198_v9 = vadd.f32 %v853_v46, %v197_v7  ;;  %v243_v7 = vadd.f32 %v853_v46, %v242_v42 }
  0xc0   :  { %358 = vmatmul.f32.gmra.mxu1 %v578_v8 }
  0xc1   :  { %579 = vtanh.f32 %v198_v9 }
  0xc6   :  { %v200_v11 = vpop.f32.mrf.mxu0  ;;  %v248_v54 = vpop.f32.mrf.mxu3 }
  0xc7   :  { %v580_v12 = vpop.eup %579  ;;  %v201_v13 = vadd.f32 %v853_v46, %v200_v11 }
  0xc8   :  { %361 = vmatmul.f32.gmra.mxu1 %v580_v12  ;;  %v246_v12 = vadd.f32 %v853_v46, %v245_v47 }
  0xc9   :  { %581 = vtanh.f32 %v201_v13 }
  0xce   :  { %v203_v15 = vpop.f32.mrf.mxu0  ;;  %v251_v59 = vpop.f32.mrf.mxu3 }
  0xcf   :  { %v582_v16 = vpop.eup %581  ;;  %v204_v17 = vadd.f32 %v853_v46, %v203_v15 }
  0xd0   :  { %364 = vmatmul.f32.gmra.mxu1 %v582_v16 }
  0xd1   :  { %583 = vtanh.f32 %v204_v17  ;;  %v249_v17 = vadd.f32 %v853_v46, %v248_v54 }
  0xd6   :  { %v206_v19 = vpop.f32.mrf.mxu0  ;;  %v254_v0 = vpop.f32.mrf.mxu3 }
  0xd7   :  { %v584_v20 = vpop.eup %583  ;;  %v207_v21 = vadd.f32 %v853_v46, %v206_v19 }
  0xd8   :  { %367 = vmatmul.f32.gmra.mxu1 %v584_v20 }
  0xd9   :  { %585 = vtanh.f32 %v207_v21 }
  0xde   :  { %v209_v22 = vpop.f32.mrf.mxu0  ;;  %v257_v5 = vpop.f32.mrf.mxu3 }
  0xdf   :  { %v586_v23 = vpop.eup %585  ;;  %v210_v24 = vadd.f32 %v853_v46, %v209_v22  ;;  %v252_v22 = vadd.f32 %v853_v46, %v251_v59 }
  0xe0   :  { %370 = vmatmul.f32.gmra.mxu1 %v586_v23 }
  0xe1   :  { %587 = vtanh.f32 %v210_v24 }
  0xe6   :  { %v212_v25 = vpop.f32.mrf.mxu0  ;;  %v260_v10 = vpop.f32.mrf.mxu3 }
  0xe7   :  { %v588_v27 = vpop.eup %587  ;;  %v213_v28 = vadd.f32 %v853_v46, %v212_v25 }
  0xe8   :  { %373 = vmatmul.f32.gmra.mxu1 %v588_v27 }
  0xe9   :  { %589 = vtanh.f32 %v213_v28  ;;  %v255_v28 = vadd.f32 %v853_v46, %v254_v0 }
  0xee   :  { %v215_v29 = vpop.f32.mrf.mxu0  ;;  %v263_v15 = vpop.f32.mrf.mxu3 }
  0xef   :  { %v590_v31 = vpop.eup %589  ;;  %v216_v32 = vadd.f32 %v853_v46, %v215_v29 }
  0xf0   :  { %376 = vmatmul.f32.gmra.mxu1 %v590_v31 }
  0xf1   :  { %591 = vtanh.f32 %v216_v32 }
  0xf6   :  { %v218_v33 = vpop.f32.mrf.mxu0  ;;  %v266_v20 = vpop.f32.mrf.mxu3 }
  0xf7   :  { %v592_v35 = vpop.eup %591  ;;  %v219_v36 = vadd.f32 %v853_v46, %v218_v33 }
  0xf8   :  { %379 = vmatmul.f32.gmra.mxu1 %v592_v35  ;;  %v258_v35 = vadd.f32 %v853_v46, %v257_v5 }
  0xf9   :  { %593 = vtanh.f32 %v219_v36 }
  0xfe   :  { %v221_v37 = vpop.f32.mrf.mxu0  ;;  %v269_v25 = vpop.f32.mrf.mxu3 }
  0xff   :  { %v594_v39 = vpop.eup %593  ;;  %v222_v40 = vadd.f32 %v853_v46, %v221_v37  ;;  %v270_v27 = vadd.f32 %v853_v46, %v269_v25 }
 0x100   :  { %382 = vmatmul.f32.gmra.mxu1 %v594_v39 }
 0x101   :  { %595 = vtanh.f32 %v222_v40  ;;  %v261_v40 = vadd.f32 %v853_v46, %v260_v10 }
 0x106   :  { %v224_v41 = vpop.f32.mrf.mxu0  ;;  %v272_v32 = vpop.f32.mrf.mxu3 }
 0x107   :  { %v596_v43 = vpop.eup %595  ;;  %v225_v44 = vadd.f32 %v853_v46, %v224_v41  ;;  %v273_v34 = vadd.f32 %v853_v46, %v272_v32 }
 0x108   :  { %385 = vmatmul.f32.gmra.mxu1 %v596_v43 }
 0x109   :  { %597 = vtanh.f32 %v225_v44  ;;  %v264_v44 = vadd.f32 %v853_v46, %v263_v15 }
 0x10e   :  { %v227_v45 = vpop.f32.mrf.mxu0 }
 0x10f   :  { %v598_v48 = vpop.eup %597  ;;  %v228_v49 = vadd.f32 %v853_v46, %v227_v45 }
 0x110   :  { %388 = vmatmul.f32.vlgmr.msra.gmra.mxu2 %v598_v48 }
 0x111   :  { %599 = vtanh.f32 %v228_v49  ;;  %v267_v49 = vadd.f32 %v853_v46, %v266_v20 }
 0x112   :  { %601 = vtanh.f32 %v231_v51 }
 0x113   :  { %603 = vtanh.f32 %v234_v56 }
 0x114   :  { %605 = vtanh.f32 %v237_v61 }
 0x115   :  { %v344_v52 = vpop.f32.mrf.mxu1  ;;  %607 = vtanh.f32 %v240_v2 }
 0x116   :  { %v345_v53 = vadd.f32 %v915_v50, %v344_v52  ;;  %609 = vtanh.f32 %v243_v7 }
 0x117   :  { %v600_v55 = vpop.eup %599  ;;  %611 = vtanh.f32 %v246_v12 }
 0x118   :  { %440 = vst [vmem:[#allocation2] sm:$0xff] %v345_v53  ;;  %391 = vmatmul.f32.gmra.mxu2 %v600_v55  ;;  %v602_v60 = vpop.eup %601  ;;  %613 = vtanh.f32 %v249_v17 }
 0x119   :  { %v604_v1 = vpop.eup %603  ;;  %615 = vtanh.f32 %v252_v22 }
 0x11a   :  { %v606_v6 = vpop.eup %605  ;;  %617 = vtanh.f32 %v270_v27 }
 0x11b   :  { %v608_v11 = vpop.eup %607  ;;  %619 = vtanh.f32 %v255_v28 }
 0x11c   :  { %v610_v16 = vpop.eup %609  ;;  %621 = vtanh.f32 %v273_v34 }
 0x11d   :  { %v347_v57 = vpop.f32.mrf.mxu1  ;;  %v612_v21 = vpop.eup %611  ;;  %623 = vtanh.f32 %v258_v35 }
 0x11e   :  { %v348_v58 = vadd.f32 %v915_v50, %v347_v57  ;;  %v614_v26 = vpop.eup %613  ;;  %625 = vtanh.f32 %v261_v40 }
 0x11f   :  { %v616_v30 = vpop.eup %615  ;;  %627 = vtanh.f32 %v264_v44 }
 0x120   :  { %441 = vst [vmem:[#allocation2 + $0x8] sm:$0xff] %v348_v58  ;;  %394 = vmatmul.f32.gmra.mxu2 %v602_v60  ;;  %v618_v33 = vpop.eup %617  ;;  %629 = vtanh.f32 %v267_v49 }
 0x121   :  { %433 = vmatmul.f32.vlgmr.msrb.gmra.mxu3 %v618_v33  ;;  %v620_v37 = vpop.eup %619 }
 0x122   :  { %v622_v39 = vpop.eup %621 }
 0x123   :  { %v624_v43 = vpop.eup %623 }
 0x124   :  { %v626_v48 = vpop.eup %625 }
 0x125   :  { %v350_v62 = vpop.f32.mrf.mxu1  ;;  %v628_v53 = vpop.eup %627 }
 0x126   :  { %v351_v63 = vadd.f32 %v915_v50, %v350_v62  ;;  %v630_v56 = vpop.eup %629 }
 0x128   :  { %442 = vst [vmem:[#allocation2 + $0x10] sm:$0xff] %v351_v63  ;;  %397 = vmatmul.f32.gmra.mxu2 %v604_v1 }
 0x129   :  { %436 = vmatmul.f32.gmra.mxu3 %v622_v39 }
 0x12d   :  { %v353_v3 = vpop.f32.mrf.mxu1 }
 0x12e   :  { %v354_v4 = vadd.f32 %v915_v50, %v353_v3 }
 0x130   :  { %443 = vst [vmem:[#allocation2 + $0x18] sm:$0xff] %v354_v4  ;;  %400 = vmatmul.f32.gmra.mxu2 %v606_v6 }
 0x135   :  { %v356_v8 = vpop.f32.mrf.mxu1 }
 0x136   :  { %v357_v9 = vadd.f32 %v915_v50, %v356_v8 }
 0x138   :  { %444 = vst [vmem:[#allocation2 + $0x20] sm:$0xff] %v357_v9  ;;  %403 = vmatmul.f32.gmra.mxu2 %v608_v11 }
 0x13d   :  { %v359_v13 = vpop.f32.mrf.mxu1 }
 0x13e   :  { %v360_v14 = vadd.f32 %v915_v50, %v359_v13 }
 0x140   :  { %445 = vst [vmem:[#allocation2 + $0x28] sm:$0xff] %v360_v14  ;;  %406 = vmatmul.f32.gmra.mxu2 %v610_v16 }
 0x145   :  { %v362_v18 = vpop.f32.mrf.mxu1 }
 0x146   :  { %v363_v19 = vadd.f32 %v915_v50, %v362_v18 }
 0x148   :  { %446 = vst [vmem:[#allocation2 + $0x30] sm:$0xff] %v363_v19  ;;  %409 = vmatmul.f32.gmra.mxu2 %v612_v21 }
 0x14d   :  { %v365_v23 = vpop.f32.mrf.mxu1 }
 0x14e   :  { %v366_v24 = vadd.f32 %v915_v50, %v365_v23 }
 0x150   :  { %447 = vst [vmem:[#allocation2 + $0x38] sm:$0xff] %v366_v24  ;;  %412 = vmatmul.f32.gmra.mxu2 %v614_v26 }
 0x155   :  { %v368_v29 = vpop.f32.mrf.mxu1 }
 0x156   :  { %v369_v31 = vadd.f32 %v915_v50, %v368_v29 }
 0x158   :  { %448 = vst [vmem:[#allocation2 + $0x40] sm:$0xff] %v369_v31  ;;  %415 = vmatmul.f32.gmra.mxu2 %v616_v30 }
 0x15d   :  { %v371_v36 = vpop.f32.mrf.mxu1 }
 0x15e   :  { %v372_v38 = vadd.f32 %v915_v50, %v371_v36 }
 0x160   :  { %449 = vst [vmem:[#allocation2 + $0x48] sm:$0xff] %v372_v38  ;;  %418 = vmatmul.f32.gmra.mxu2 %v620_v37 }
 0x165   :  { %v374_v41 = vpop.f32.mrf.mxu1 }
 0x166   :  { %v375_v42 = vadd.f32 %v915_v50, %v374_v41 }
 0x168   :  { %450 = vst [vmem:[#allocation2 + $0x50] sm:$0xff] %v375_v42  ;;  %421 = vmatmul.f32.gmra.mxu2 %v624_v43 }
 0x16d   :  { %v377_v45 = vpop.f32.mrf.mxu1 }
 0x16e   :  { %v378_v47 = vadd.f32 %v915_v50, %v377_v45 }
 0x170   :  { %451 = vst [vmem:[#allocation2 + $0x58] sm:$0xff] %v378_v47  ;;  %424 = vmatmul.f32.gmra.mxu2 %v626_v48 }
 0x175   :  { %v380_v51 = vpop.f32.mrf.mxu1 }
 0x176   :  { %v381_v52 = vadd.f32 %v915_v50, %v380_v51 }
 0x178   :  { %452 = vst [vmem:[#allocation2 + $0x60] sm:$0xff] %v381_v52  ;;  %427 = vmatmul.f32.gmra.mxu2 %v628_v53 }
 0x17d   :  { %v383_v54 = vpop.f32.mrf.mxu1 }
 0x17e   :  { %v384_v55 = vadd.f32 %v915_v50, %v383_v54 }
 0x180   :  { %453 = vst [vmem:[#allocation2 + $0x68] sm:$0xff] %v384_v55  ;;  %430 = vmatmul.f32.gmra.mxu2 %v630_v56 }
 0x185   :  { %v386_v57 = vpop.f32.mrf.mxu1 }
 0x186   :  { %v387_v58 = vadd.f32 %v915_v50, %v386_v57 }
 0x188   :  { %454 = vst [vmem:[#allocation2 + $0x70] sm:$0xff] %v387_v58 }
 0x193   :  { %v389_v59 = vpop.f32.mrf.mxu2 }
 0x194   :  { %v390_v46 = vadd.f32 %v915_v50, %v389_v59 }
 0x196   :  { %455 = vst [vmem:[#allocation2 + $0x78] sm:$0xff] %v390_v46 }
 0x19b   :  { %v392_v60 = vpop.f32.mrf.mxu2 }
 0x19c   :  { %v393_v61 = vadd.f32 %v915_v50, %v392_v60 }
 0x19e   :  { %456 = vst [vmem:[#allocation2 + $0x80] sm:$0xff] %v393_v61 }
 0x1a3   :  { %v395_v62 = vpop.f32.mrf.mxu2 }
 0x1a4   :  { %v396_v63 = vadd.f32 %v915_v50, %v395_v62  ;;  %v434_v13 = vpop.f32.mrf.mxu3 }
 0x1a5   :  { %v435_v15 = vadd.f32 %v915_v50, %v434_v13 }
 0x1a6   :  { %457 = vst [vmem:[#allocation2 + $0x88] sm:$0xff] %v396_v63 }
 0x1a7   :  { %470 = vst [vmem:[#allocation2 + $0xf0] sm:$0xff] %v435_v15 }
 0x1ab   :  { %v398_v0 = vpop.f32.mrf.mxu2 }
 0x1ac   :  { %v399_v1 = vadd.f32 %v915_v50, %v398_v0  ;;  %v437_v17 = vpop.f32.mrf.mxu3 }
 0x1ad   :  { %v438_v19 = vadd.f32 %v915_v50, %v437_v17 }
 0x1ae   :  { %458 = vst [vmem:[#allocation2 + $0x90] sm:$0xff] %v399_v1 }
 0x1af   :  { %471 = vst [vmem:[#allocation2 + $0xf8] sm:$0xff] %v438_v19 }
 0x1b3   :  { %v401_v2 = vpop.f32.mrf.mxu2 }
 0x1b4   :  { %v402_v3 = vadd.f32 %v915_v50, %v401_v2 }
 0x1b6   :  { %459 = vst [vmem:[#allocation2 + $0x98] sm:$0xff] %v402_v3 }
 0x1bb   :  { %v404_v4 = vpop.f32.mrf.mxu2 }
 0x1bc   :  { %v405_v5 = vadd.f32 %v915_v50, %v404_v4 }
 0x1be   :  { %460 = vst [vmem:[#allocation2 + $0xa0] sm:$0xff] %v405_v5 }
 0x1c3   :  { %v407_v6 = vpop.f32.mrf.mxu2 }
 0x1c4   :  { %v408_v7 = vadd.f32 %v915_v50, %v407_v6 }
 0x1c6   :  { %461 = vst [vmem:[#allocation2 + $0xa8] sm:$0xff] %v408_v7 }
 0x1cb   :  { %v410_v8 = vpop.f32.mrf.mxu2 }
 0x1cc   :  { %v411_v9 = vadd.f32 %v915_v50, %v410_v8 }
 0x1ce   :  { %462 = vst [vmem:[#allocation2 + $0xb0] sm:$0xff] %v411_v9 }
 0x1d3   :  { %v413_v10 = vpop.f32.mrf.mxu2 }
 0x1d4   :  { %v414_v11 = vadd.f32 %v915_v50, %v413_v10 }
 0x1d6   :  { %463 = vst [vmem:[#allocation2 + $0xb8] sm:$0xff] %v414_v11 }
 0x1db   :  { %v416_v12 = vpop.f32.mrf.mxu2 }
 0x1dc   :  { %v417_v14 = vadd.f32 %v915_v50, %v416_v12 }
 0x1de   :  { %464 = vst [vmem:[#allocation2 + $0xc0] sm:$0xff] %v417_v14 }
 0x1e3   :  { %v419_v16 = vpop.f32.mrf.mxu2 }
 0x1e4   :  { %v420_v18 = vadd.f32 %v915_v50, %v419_v16 }
 0x1e6   :  { %465 = vst [vmem:[#allocation2 + $0xc8] sm:$0xff] %v420_v18 }
 0x1eb   :  { %v422_v20 = vpop.f32.mrf.mxu2 }
 0x1ec   :  { %v423_v21 = vadd.f32 %v915_v50, %v422_v20 }
 0x1ee   :  { %466 = vst [vmem:[#allocation2 + $0xd0] sm:$0xff] %v423_v21 }
 0x1f3   :  { %v425_v22 = vpop.f32.mrf.mxu2 }
 0x1f4   :  { %v426_v23 = vadd.f32 %v915_v50, %v425_v22 }
 0x1f6   :  { %467 = vst [vmem:[#allocation2 + $0xd8] sm:$0xff] %v426_v23 }
 0x1fb   :  { %v428_v24 = vpop.f32.mrf.mxu2 }
 0x1fc   :  { %v429_v25 = vadd.f32 %v915_v50, %v428_v24 }
 0x1fe   :  { %468 = vst [vmem:[#allocation2 + $0xe0] sm:$0xff] %v429_v25 }
 0x203   :  { %v431_v26 = vpop.f32.mrf.mxu2 }
 0x204   :  { %v432_v27 = vadd.f32 %v915_v50, %v431_v26 }
 0x206   :  { %469 = vst [vmem:[#allocation2 + $0xe8] sm:$0xff] %v432_v27 }
 0x207   :  { %484 = dma.vmem_to_hbm [thread:$0]  %s477_s26, 4096, %s479_s29, [#allocation3], %s658_s30, %s658_s30, %s659_s6  }
 0x208   :  { %655 = dma.done.wait [#allocation3], 4096  }
 0x209   :  { %656 = vsyncadd [#allocation3], 4294963200 }
 0x20a   :  { %489 = vsyncpa [#allocation3], 1 }

// kernel: tpu_custom_call.1
= control target key start
LH: loop header
LB: loop body
LE: loop exit
PB: predicated region body
PF: predicated region fallthrough
CT: control target
= control target key end

     0   :  { %s967_s0 = inlined_call_operand.vmem [shape: f32[256,64], index: 0, kind: input, shape index: {}]   ;;  %s968_s1 = inlined_call_operand.vmem [shape: f32[64,128], index: 1, kind: input, shape index: {}]   ;;  %s969_s2 = inlined_call_operand.vmem [shape: f32[1,128], index: 2, kind: input, shape index: {}]   ;;  %s970_s3 = inlined_call_operand.vmem [shape: f32[128,128], index: 3, kind: input, shape index: {}]   ;;  %s971_s4 = inlined_call_operand.vmem [shape: f32[1,128], index: 4, kind: input, shape index: {}]   ;;  %s972_s5 = inlined_call_operand.hbm [shape: f32[256,128], index: 5, kind: output, shape index: {}]  }
   0x1   :  { %v60_v0 = vld [vmem:[%s968_s1 + $0x38] sm:$0xff]  ;;  %v59_v1 = vld [vmem:[%s968_s1 + $0x30] sm:$0xff]  ;;  %v58_v2 = vld [vmem:[%s968_s1 + $0x28] sm:$0xff] }
   0x2   :  { %170 = vmatpush.msra.mxu0 %v60_v0  ;;  %522 = vmatpush.msra.mxu3 %v60_v0  ;;  %v57_v3 = vld [vmem:[%s968_s1 + $0x20] sm:$0xff] }
   0x4   :  { %171 = vmatpush.msra.mxu0 %v59_v1  ;;  %523 = vmatpush.msra.mxu3 %v59_v1 }
   0x5   :  { %10 = vsyncpa [#allocation3], 0  ;;  %v56_v4 = vld [vmem:[%s968_s1 + $0x18] sm:$0xff]  ;;  %v55_v5 = vld [vmem:[%s968_s1 + $0x10] sm:$0xff]  ;;  %vm65_vm0 = vcmask 523264   ;;  %s478_s29 = sshll.u32 %s972_s5, 4  ;;  %s479_s29 = int_to_ptr.hbm [resolvable:$true] %s478_s29 }
   0x6   :  { %172 = vmatpush.msra.mxu0 %v58_v2  ;;  %524 = vmatpush.msra.mxu3 %v58_v2  ;;  %v54_v6 = vld [vmem:[%s968_s1 + $0x8] sm:$0xff]  ;;  %v53_v7 = vld [vmem:[%s968_s1] sm:$0xff]  ;;  %v23_v10 = vld [vmem:[%s967_s0 + $0x10] sm:$0xff]  ;;  %s658_s30 = smov 128   ;;  %s659_s6 = smov 8  }
   0x7   :  { %v21_v8 = vld [vmem:[%s967_s0] sm:$0xff]  ;;  %v22_v9 = vld [vmem:[%s967_s0 + $0x8] sm:$0xff]  ;;  %v24_v11 = vld [vmem:[%s967_s0 + $0x18] sm:$0xff] }
   0x8   :  { %173 = vmatpush.msra.mxu0 %v57_v3  ;;  %525 = vmatpush.msra.mxu3 %v57_v3  ;;  %v25_v12 = vld [vmem:[%s967_s0 + $0x20] sm:$0xff]  ;;  %v26_v13 = vld [vmem:[%s967_s0 + $0x28] sm:$0xff]  ;;  %v27_v14 = vld [vmem:[%s967_s0 + $0x30] sm:$0xff] }
   0x9   :  { %v28_v15 = vld [vmem:[%s967_s0 + $0x38] sm:$0xff]  ;;  %v29_v16 = vld [vmem:[%s967_s0 + $0x40] sm:$0xff]  ;;  %v30_v17 = vld [vmem:[%s967_s0 + $0x48] sm:$0xff] }
   0xa   :  { %174 = vmatpush.msra.mxu0 %v56_v4  ;;  %526 = vmatpush.msra.mxu3 %v56_v4  ;;  %v322_v18 = vld [vmem:[%s970_s3 + $0x78] sm:$0xff]  ;;  %v321_v19 = vld [vmem:[%s970_s3 + $0x70] sm:$0xff]  ;;  %v320_v20 = vld [vmem:[%s970_s3 + $0x68] sm:$0xff] }
   0xb   :  { %327 = vmatpush.msra.mxu1 %v322_v18  ;;  %530 = vmatpush.msra.mxu2 %v322_v18  ;;  %v319_v21 = vld [vmem:[%s970_s3 + $0x60] sm:$0xff]  ;;  %v31_v22 = vld [vmem:[%s967_s0 + $0x50] sm:$0xff]  ;;  %v318_v23 = vld [vmem:[%s970_s3 + $0x58] sm:$0xff] }
   0xc   :  { %175 = vmatpush.msra.mxu0 %v55_v5  ;;  %527 = vmatpush.msra.mxu3 %v55_v5  ;;  %v38_v24 = vld [vmem:[%s967_s0 + $0x88] sm:$0xff]  ;;  %v317_v25 = vld [vmem:[%s970_s3 + $0x50] sm:$0xff]  ;;  %v315_v27 = vld [vmem:[%s970_s3 + $0x40] sm:$0xff] }
   0xd   :  { %328 = vmatpush.msra.mxu1 %v321_v19  ;;  %532 = vmatpush.msra.mxu2 %v321_v19  ;;  %v316_v26 = vld [vmem:[%s970_s3 + $0x48] sm:$0xff]  ;;  %v32_v28 = vld [vmem:[%s967_s0 + $0x58] sm:$0xff]  ;;  %v39_v30 = vld [vmem:[%s967_s0 + $0x90] sm:$0xff] }
   0xe   :  { %176 = vmatpush.msra.mxu0 %v54_v6  ;;  %528 = vmatpush.msra.mxu3 %v54_v6  ;;  %v314_v29 = vld [vmem:[%s970_s3 + $0x38] sm:$0xff]  ;;  %v313_v31 = vld [vmem:[%s970_s3 + $0x30] sm:$0xff]  ;;  %v312_v32 = vld [vmem:[%s970_s3 + $0x28] sm:$0xff] }
   0xf   :  { %329 = vmatpush.msra.mxu1 %v320_v20  ;;  %534 = vmatpush.msra.mxu2 %v320_v20  ;;  %v33_v33 = vld [vmem:[%s967_s0 + $0x60] sm:$0xff]  ;;  %v310_v35 = vld [vmem:[%s970_s3 + $0x18] sm:$0xff]  ;;  %v309_v37 = vld [vmem:[%s970_s3 + $0x10] sm:$0xff] }
  0x10   :  { %177 = vmatpush.msra.mxu0 %v53_v7  ;;  %529 = vmatpush.msra.mxu3 %v53_v7  ;;  %v311_v34 = vld [vmem:[%s970_s3 + $0x20] sm:$0xff]  ;;  %v40_v36 = vld [vmem:[%s967_s0 + $0x98] sm:$0xff]  ;;  %v308_v38 = vld [vmem:[%s970_s3 + $0x8] sm:$0xff] }
  0x11   :  { %490 = vmatmul.msk.f32.vlgmr.msra.gmra.mxu0 %vm65_vm0, %v21_v8  ;;  %330 = vmatpush.msra.mxu1 %v319_v21  ;;  %v34_v39 = vld [vmem:[%s967_s0 + $0x68] sm:$0xff]  ;;  %v307_v40 = vld [vmem:[%s970_s3] sm:$0xff]  ;;  %v35_v42 = vld [vmem:[%s967_s0 + $0x70] sm:$0xff] }
  0x12   :  { %531 = vmatpush.msrb.mxu3 %v322_v18  ;;  %536 = vmatpush.msra.mxu2 %v319_v21  ;;  %v41_v41 = vld [vmem:[%s967_s0 + $0xa0] sm:$0xff]  ;;  %v42_v43 = vld [vmem:[%s967_s0 + $0xa8] sm:$0xff]  ;;  %v36_v44 = vld [vmem:[%s967_s0 + $0x78] sm:$0xff] }
  0x13   :  { %331 = vmatpush.msra.mxu1 %v318_v23  ;;  %507 = vmatmul.msk.f32.vlgmr.msra.gmra.mxu3 %vm65_vm0, %v38_v24  ;;  %v43_v45 = vld [vmem:[%s967_s0 + $0xb0] sm:$0xff]  ;;  %v853_v46 = vld [vmem:[%s969_s2] ss:$0 sm:$0xff]  ;;  %v44_v50 = vld [vmem:[%s967_s0 + $0xb8] sm:$0xff] }
  0x14   :  { %533 = vmatpush.msrb.mxu3 %v321_v19  ;;  %538 = vmatpush.msra.mxu2 %v318_v23  ;;  %v37_v48 = vld [vmem:[%s967_s0 + $0x80] sm:$0xff]  ;;  %v46_v58 = vld [vmem:[%s967_s0 + $0xc8] sm:$0xff]  ;;  %v47_v62 = vld [vmem:[%s967_s0 + $0xd0] sm:$0xff] }
  0x15   :  { %332 = vmatpush.msra.mxu1 %v317_v25  ;;  %v45_v54 = vld [vmem:[%s967_s0 + $0xc0] sm:$0xff]  ;;  %v48_v2 = vld [vmem:[%s967_s0 + $0xd8] sm:$0xff] }
  0x16   :  { %535 = vmatpush.msrb.mxu3 %v320_v20  ;;  %540 = vmatpush.msra.mxu2 %v317_v25  ;;  %v49_v6 = vld [vmem:[%s967_s0 + $0xe0] sm:$0xff]  ;;  %v52_v18 = vld [vmem:[%s967_s0 + $0xf8] sm:$0xff] }
  0x17   :  { %333 = vmatpush.msra.mxu1 %v316_v26 }
  0x18   :  { %537 = vmatpush.msrb.mxu3 %v319_v21  ;;  %542 = vmatpush.msra.mxu2 %v316_v26 }
  0x19   :  { %491 = vmatmul.msk.f32.gmra.mxu0 %vm65_vm0, %v22_v9  ;;  %334 = vmatpush.msra.mxu1 %v315_v27 }
  0x1a   :  { %539 = vmatpush.msrb.mxu3 %v318_v23  ;;  %544 = vmatpush.msra.mxu2 %v315_v27 }
  0x1b   :  { %335 = vmatpush.msra.mxu1 %v314_v29  ;;  %508 = vmatmul.msk.f32.gmra.mxu3 %vm65_vm0, %v39_v30 }
  0x1c   :  { %541 = vmatpush.msrb.mxu3 %v317_v25  ;;  %546 = vmatpush.msra.mxu2 %v314_v29 }
  0x1d   :  { %336 = vmatpush.msra.mxu1 %v313_v31 }
  0x1e   :  { %543 = vmatpush.msrb.mxu3 %v316_v26  ;;  %548 = vmatpush.msra.mxu2 %v313_v31 }
  0x1f   :  { %337 = vmatpush.msra.mxu1 %v312_v32 }
  0x20   :  { %545 = vmatpush.msrb.mxu3 %v315_v27  ;;  %550 = vmatpush.msra.mxu2 %v312_v32 }
  0x21   :  { %492 = vmatmul.msk.f32.gmra.mxu0 %vm65_vm0, %v23_v10  ;;  %338 = vmatpush.msra.mxu1 %v311_v34  ;;  %v50_v10 = vld [vmem:[%s967_s0 + $0xe8] sm:$0xff] }
  0x22   :  { %547 = vmatpush.msrb.mxu3 %v314_v29  ;;  %552 = vmatpush.msra.mxu2 %v311_v34 }
  0x23   :  { %339 = vmatpush.msra.mxu1 %v310_v35  ;;  %509 = vmatmul.msk.f32.gmra.mxu3 %vm65_vm0, %v40_v36 }
  0x24   :  { %549 = vmatpush.msrb.mxu3 %v313_v31  ;;  %554 = vmatpush.msra.mxu2 %v310_v35 }
  0x25   :  { %340 = vmatpush.msra.mxu1 %v309_v37 }
  0x26   :  { %551 = vmatpush.msrb.mxu3 %v312_v32  ;;  %556 = vmatpush.msra.mxu2 %v309_v37 }
  0x27   :  { %341 = vmatpush.msra.mxu1 %v308_v38 }
  0x28   :  { %553 = vmatpush.msrb.mxu3 %v311_v34  ;;  %558 = vmatpush.msra.mxu2 %v308_v38 }
  0x29   :  { %493 = vmatmul.msk.f32.gmra.mxu0 %vm65_vm0, %v24_v11  ;;  %342 = vmatpush.msra.mxu1 %v307_v40 }
  0x2a   :  { %555 = vmatpush.msrb.mxu3 %v310_v35  ;;  %560 = vmatpush.msra.mxu2 %v307_v40 }
  0x2b   :  { %510 = vmatmul.msk.f32.gmra.mxu3 %vm65_vm0, %v41_v41 }
  0x2c   :  { %557 = vmatpush.msrb.mxu3 %v309_v37 }
  0x2e   :  { %559 = vmatpush.msrb.mxu3 %v308_v38 }
  0x30   :  { %561 = vmatpush.msrb.mxu3 %v307_v40 }
  0x31   :  { %494 = vmatmul.msk.f32.gmra.mxu0 %vm65_vm0, %v25_v12 }
  0x33   :  { %511 = vmatmul.msk.f32.gmra.mxu3 %vm65_vm0, %v42_v43 }
  0x39   :  { %495 = vmatmul.msk.f32.gmra.mxu0 %vm65_vm0, %v26_v13 }
  0x3b   :  { %512 = vmatmul.msk.f32.gmra.mxu3 %vm65_vm0, %v43_v45 }
  0x41   :  { %496 = vmatmul.msk.f32.gmra.mxu0 %vm65_vm0, %v27_v14  ;;  %v51_v14 = vld [vmem:[%s967_s0 + $0xf0] sm:$0xff] }
  0x43   :  { %513 = vmatmul.msk.f32.gmra.mxu3 %vm65_vm0, %v44_v50  ;;  %v915_v50 = vld [vmem:[%s971_s4] ss:$0 sm:$0xff]  ;;  %s657_s4 = smov [#allocation2]  }
  0x44   :  { %s476_s26 = sshll.u32 %s657_s4, 4  ;;  %s477_s26 = int_to_ptr.vmem [resolvable:$true] %s476_s26 }
  0x49   :  { %497 = vmatmul.msk.f32.gmra.mxu0 %vm65_vm0, %v28_v15 }
  0x4b   :  { %514 = vmatmul.msk.f32.gmra.mxu3 %vm65_vm0, %v45_v54 }
  0x51   :  { %498 = vmatmul.msk.f32.gmra.mxu0 %vm65_vm0, %v29_v16 }
  0x53   :  { %515 = vmatmul.msk.f32.gmra.mxu3 %vm65_vm0, %v46_v58 }
  0x59   :  { %499 = vmatmul.msk.f32.gmra.mxu0 %vm65_vm0, %v30_v17 }
  0x5b   :  { %516 = vmatmul.msk.f32.gmra.mxu3 %vm65_vm0, %v47_v62 }
  0x61   :  { %500 = vmatmul.msk.f32.gmra.mxu0 %vm65_vm0, %v31_v22 }
  0x63   :  { %517 = vmatmul.msk.f32.gmra.mxu3 %vm65_vm0, %v48_v2 }
  0x69   :  { %501 = vmatmul.msk.f32.gmra.mxu0 %vm65_vm0, %v32_v28 }
  0x6b   :  { %518 = vmatmul.msk.f32.gmra.mxu3 %vm65_vm0, %v49_v6 }
  0x71   :  { %502 = vmatmul.msk.f32.gmra.mxu0 %vm65_vm0, %v33_v33 }
  0x73   :  { %519 = vmatmul.msk.f32.gmra.mxu3 %vm65_vm0, %v50_v10 }
  0x79   :  { %503 = vmatmul.msk.f32.gmra.mxu0 %vm65_vm0, %v34_v39 }
  0x7b   :  { %520 = vmatmul.msk.f32.gmra.mxu3 %vm65_vm0, %v51_v14 }
  0x81   :  { %504 = vmatmul.msk.f32.gmra.mxu0 %vm65_vm0, %v35_v42 }
  0x83   :  { %521 = vmatmul.msk.f32.gmra.mxu3 %vm65_vm0, %v52_v18 }
  0x89   :  { %505 = vmatmul.msk.f32.gmra.mxu0 %vm65_vm0, %v36_v44 }
  0x8e   :  { %v179_v47 = vpop.f32.mrf.mxu0 }
  0x8f   :  { %v180_v49 = vadd.f32 %v853_v46, %v179_v47 }
  0x91   :  { %567 = vtanh.f32 %v180_v49  ;;  %506 = vmatmul.msk.f32.gmra.mxu0 %vm65_vm0, %v37_v48 }
  0x96   :  { %v182_v51 = vpop.f32.mrf.mxu0  ;;  %v230_v26 = vpop.f32.mrf.mxu3 }
  0x97   :  { %v568_v52 = vpop.eup %567  ;;  %v183_v53 = vadd.f32 %v853_v46, %v182_v51  ;;  %v231_v51 = vadd.f32 %v853_v46, %v230_v26 }
  0x98   :  { %343 = vmatmul.f32.vlgmr.msra.gmra.mxu1 %v568_v52 }
  0x99   :  { %569 = vtanh.f32 %v183_v53 }
  0x9e   :  { %v185_v55 = vpop.f32.mrf.mxu0  ;;  %v233_v30 = vpop.f32.mrf.mxu3 }
  0x9f   :  { %v570_v56 = vpop.eup %569  ;;  %v186_v57 = vadd.f32 %v853_v46, %v185_v55 }
  0xa0   :  { %346 = vmatmul.f32.gmra.mxu1 %v570_v56  ;;  %v234_v56 = vadd.f32 %v853_v46, %v233_v30 }
  0xa1   :  { %571 = vtanh.f32 %v186_v57 }
  0xa6   :  { %v188_v59 = vpop.f32.mrf.mxu0  ;;  %v236_v34 = vpop.f32.mrf.mxu3 }
  0xa7   :  { %v572_v60 = vpop.eup %571  ;;  %v189_v61 = vadd.f32 %v853_v46, %v188_v59 }
  0xa8   :  { %349 = vmatmul.f32.gmra.mxu1 %v572_v60 }
  0xa9   :  { %573 = vtanh.f32 %v189_v61  ;;  %v237_v61 = vadd.f32 %v853_v46, %v236_v34 }
  0xae   :  { %v191_v63 = vpop.f32.mrf.mxu0  ;;  %v239_v38 = vpop.f32.mrf.mxu3 }
  0xaf   :  { %v574_v0 = vpop.eup %573  ;;  %v192_v1 = vadd.f32 %v853_v46, %v191_v63  ;;  %v240_v2 = vadd.f32 %v853_v46, %v239_v38 }
  0xb0   :  { %352 = vmatmul.f32.gmra.mxu1 %v574_v0 }
  0xb1   :  { %575 = vtanh.f32 %v192_v1 }
  0xb6   :  { %v194_v3 = vpop.f32.mrf.mxu0  ;;  %v242_v42 = vpop.f32.mrf.mxu3 }
  0xb7   :  { %v576_v4 = vpop.eup %575  ;;  %v195_v5 = vadd.f32 %v853_v46, %v194_v3 }
  0xb8   :  { %355 = vmatmul.f32.gmra.mxu1 %v576_v4 }
  0xb9   :  { %577 = vtanh.f32 %v195_v5 }
  0xbe   :  { %v197_v7 = vpop.f32.mrf.mxu0  ;;  %v245_v47 = vpop.f32.mrf.mxu3 }
  0xbf   :  { %v578_v8 = vpop.eup %577  ;;  %v198_v9 = vadd.f32 %v853_v46, %v197_v7  ;;  %v243_v7 = vadd.f32 %v853_v46, %v242_v42 }
  0xc0   :  { %358 = vmatmul.f32.gmra.mxu1 %v578_v8 }
  0xc1   :  { %579 = vtanh.f32 %v198_v9 }
  0xc6   :  { %v200_v11 = vpop.f32.mrf.mxu0  ;;  %v248_v54 = vpop.f32.mrf.mxu3 }
  0xc7   :  { %v580_v12 = vpop.eup %579  ;;  %v201_v13 = vadd.f32 %v853_v46, %v200_v11 }
  0xc8   :  { %361 = vmatmul.f32.gmra.mxu1 %v580_v12  ;;  %v246_v12 = vadd.f32 %v853_v46, %v245_v47 }
  0xc9   :  { %581 = vtanh.f32 %v201_v13 }
  0xce   :  { %v203_v15 = vpop.f32.mrf.mxu0  ;;  %v251_v59 = vpop.f32.mrf.mxu3 }
  0xcf   :  { %v582_v16 = vpop.eup %581  ;;  %v204_v17 = vadd.f32 %v853_v46, %v203_v15 }
  0xd0   :  { %364 = vmatmul.f32.gmra.mxu1 %v582_v16 }
  0xd1   :  { %583 = vtanh.f32 %v204_v17  ;;  %v249_v17 = vadd.f32 %v853_v46, %v248_v54 }
  0xd6   :  { %v206_v19 = vpop.f32.mrf.mxu0  ;;  %v254_v0 = vpop.f32.mrf.mxu3 }
  0xd7   :  { %v584_v20 = vpop.eup %583  ;;  %v207_v21 = vadd.f32 %v853_v46, %v206_v19 }
  0xd8   :  { %367 = vmatmul.f32.gmra.mxu1 %v584_v20 }
  0xd9   :  { %585 = vtanh.f32 %v207_v21 }
  0xde   :  { %v209_v22 = vpop.f32.mrf.mxu0  ;;  %v257_v5 = vpop.f32.mrf.mxu3 }
  0xdf   :  { %v586_v23 = vpop.eup %585  ;;  %v210_v24 = vadd.f32 %v853_v46, %v209_v22  ;;  %v252_v22 = vadd.f32 %v853_v46, %v251_v59 }
  0xe0   :  { %370 = vmatmul.f32.gmra.mxu1 %v586_v23 }
  0xe1   :  { %587 = vtanh.f32 %v210_v24 }
  0xe6   :  { %v212_v25 = vpop.f32.mrf.mxu0  ;;  %v260_v10 = vpop.f32.mrf.mxu3 }
  0xe7   :  { %v588_v27 = vpop.eup %587  ;;  %v213_v28 = vadd.f32 %v853_v46, %v212_v25 }
  0xe8   :  { %373 = vmatmul.f32.gmra.mxu1 %v588_v27 }
  0xe9   :  { %589 = vtanh.f32 %v213_v28  ;;  %v255_v28 = vadd.f32 %v853_v46, %v254_v0 }
  0xee   :  { %v215_v29 = vpop.f32.mrf.mxu0  ;;  %v263_v15 = vpop.f32.mrf.mxu3 }
  0xef   :  { %v590_v31 = vpop.eup %589  ;;  %v216_v32 = vadd.f32 %v853_v46, %v215_v29 }
  0xf0   :  { %376 = vmatmul.f32.gmra.mxu1 %v590_v31 }
  0xf1   :  { %591 = vtanh.f32 %v216_v32 }
  0xf6   :  { %v218_v33 = vpop.f32.mrf.mxu0  ;;  %v266_v20 = vpop.f32.mrf.mxu3 }
  0xf7   :  { %v592_v35 = vpop.eup %591  ;;  %v219_v36 = vadd.f32 %v853_v46, %v218_v33 }
  0xf8   :  { %379 = vmatmul.f32.gmra.mxu1 %v592_v35  ;;  %v258_v35 = vadd.f32 %v853_v46, %v257_v5 }
  0xf9   :  { %593 = vtanh.f32 %v219_v36 }
  0xfe   :  { %v221_v37 = vpop.f32.mrf.mxu0  ;;  %v269_v25 = vpop.f32.mrf.mxu3 }
  0xff   :  { %v594_v39 = vpop.eup %593  ;;  %v222_v40 = vadd.f32 %v853_v46, %v221_v37  ;;  %v270_v27 = vadd.f32 %v853_v46, %v269_v25 }
 0x100   :  { %382 = vmatmul.f32.gmra.mxu1 %v594_v39 }
 0x101   :  { %595 = vtanh.f32 %v222_v40  ;;  %v261_v40 = vadd.f32 %v853_v46, %v260_v10 }
 0x106   :  { %v224_v41 = vpop.f32.mrf.mxu0  ;;  %v272_v32 = vpop.f32.mrf.mxu3 }
 0x107   :  { %v596_v43 = vpop.eup %595  ;;  %v225_v44 = vadd.f32 %v853_v46, %v224_v41  ;;  %v273_v34 = vadd.f32 %v853_v46, %v272_v32 }
 0x108   :  { %385 = vmatmul.f32.gmra.mxu1 %v596_v43 }
 0x109   :  { %597 = vtanh.f32 %v225_v44  ;;  %v264_v44 = vadd.f32 %v853_v46, %v263_v15 }
 0x10e   :  { %v227_v45 = vpop.f32.mrf.mxu0 }
 0x10f   :  { %v598_v48 = vpop.eup %597  ;;  %v228_v49 = vadd.f32 %v853_v46, %v227_v45 }
 0x110   :  { %388 = vmatmul.f32.vlgmr.msra.gmra.mxu2 %v598_v48 }
 0x111   :  { %599 = vtanh.f32 %v228_v49  ;;  %v267_v49 = vadd.f32 %v853_v46, %v266_v20 }
 0x112   :  { %601 = vtanh.f32 %v231_v51 }
 0x113   :  { %603 = vtanh.f32 %v234_v56 }
 0x114   :  { %605 = vtanh.f32 %v237_v61 }
 0x115   :  { %v344_v52 = vpop.f32.mrf.mxu1  ;;  %607 = vtanh.f32 %v240_v2 }
 0x116   :  { %v345_v53 = vadd.f32 %v915_v50, %v344_v52  ;;  %609 = vtanh.f32 %v243_v7 }
 0x117   :  { %v600_v55 = vpop.eup %599  ;;  %611 = vtanh.f32 %v246_v12 }
 0x118   :  { %440 = vst [vmem:[#allocation2] sm:$0xff] %v345_v53  ;;  %391 = vmatmul.f32.gmra.mxu2 %v600_v55  ;;  %v602_v60 = vpop.eup %601  ;;  %613 = vtanh.f32 %v249_v17 }
 0x119   :  { %v604_v1 = vpop.eup %603  ;;  %615 = vtanh.f32 %v252_v22 }
 0x11a   :  { %v606_v6 = vpop.eup %605  ;;  %617 = vtanh.f32 %v270_v27 }
 0x11b   :  { %v608_v11 = vpop.eup %607  ;;  %619 = vtanh.f32 %v255_v28 }
 0x11c   :  { %v610_v16 = vpop.eup %609  ;;  %621 = vtanh.f32 %v273_v34 }
 0x11d   :  { %v347_v57 = vpop.f32.mrf.mxu1  ;;  %v612_v21 = vpop.eup %611  ;;  %623 = vtanh.f32 %v258_v35 }
 0x11e   :  { %v348_v58 = vadd.f32 %v915_v50, %v347_v57  ;;  %v614_v26 = vpop.eup %613  ;;  %625 = vtanh.f32 %v261_v40 }
 0x11f   :  { %v616_v30 = vpop.eup %615  ;;  %627 = vtanh.f32 %v264_v44 }
 0x120   :  { %441 = vst [vmem:[#allocation2 + $0x8] sm:$0xff] %v348_v58  ;;  %394 = vmatmul.f32.gmra.mxu2 %v602_v60  ;;  %v618_v33 = vpop.eup %617  ;;  %629 = vtanh.f32 %v267_v49 }
 0x121   :  { %433 = vmatmul.f32.vlgmr.msrb.gmra.mxu3 %v618_v33  ;;  %v620_v37 = vpop.eup %619 }
 0x122   :  { %v622_v39 = vpop.eup %621 }
 0x123   :  { %v624_v43 = vpop.eup %623 }
 0x124   :  { %v626_v48 = vpop.eup %625 }
 0x125   :  { %v350_v62 = vpop.f32.mrf.mxu1  ;;  %v628_v53 = vpop.eup %627 }
 0x126   :  { %v351_v63 = vadd.f32 %v915_v50, %v350_v62  ;;  %v630_v56 = vpop.eup %629 }
 0x128   :  { %442 = vst [vmem:[#allocation2 + $0x10] sm:$0xff] %v351_v63  ;;  %397 = vmatmul.f32.gmra.mxu2 %v604_v1 }
 0x129   :  { %436 = vmatmul.f32.gmra.mxu3 %v622_v39 }
 0x12d   :  { %v353_v3 = vpop.f32.mrf.mxu1 }
 0x12e   :  { %v354_v4 = vadd.f32 %v915_v50, %v353_v3 }
 0x130   :  { %443 = vst [vmem:[#allocation2 + $0x18] sm:$0xff] %v354_v4  ;;  %400 = vmatmul.f32.gmra.mxu2 %v606_v6 }
 0x135   :  { %v356_v8 = vpop.f32.mrf.mxu1 }
 0x136   :  { %v357_v9 = vadd.f32 %v915_v50, %v356_v8 }
 0x138   :  { %444 = vst [vmem:[#allocation2 + $0x20] sm:$0xff] %v357_v9  ;;  %403 = vmatmul.f32.gmra.mxu2 %v608_v11 }
 0x13d   :  { %v359_v13 = vpop.f32.mrf.mxu1 }
 0x13e   :  { %v360_v14 = vadd.f32 %v915_v50, %v359_v13 }
 0x140   :  { %445 = vst [vmem:[#allocation2 + $0x28] sm:$0xff] %v360_v14  ;;  %406 = vmatmul.f32.gmra.mxu2 %v610_v16 }
 0x145   :  { %v362_v18 = vpop.f32.mrf.mxu1 }
 0x146   :  { %v363_v19 = vadd.f32 %v915_v50, %v362_v18 }
 0x148   :  { %446 = vst [vmem:[#allocation2 + $0x30] sm:$0xff] %v363_v19  ;;  %409 = vmatmul.f32.gmra.mxu2 %v612_v21 }
 0x14d   :  { %v365_v23 = vpop.f32.mrf.mxu1 }
 0x14e   :  { %v366_v24 = vadd.f32 %v915_v50, %v365_v23 }
 0x150   :  { %447 = vst [vmem:[#allocation2 + $0x38] sm:$0xff] %v366_v24  ;;  %412 = vmatmul.f32.gmra.mxu2 %v614_v26 }
 0x155   :  { %v368_v29 = vpop.f32.mrf.mxu1 }
 0x156   :  { %v369_v31 = vadd.f32 %v915_v50, %v368_v29 }
 0x158   :  { %448 = vst [vmem:[#allocation2 + $0x40] sm:$0xff] %v369_v31  ;;  %415 = vmatmul.f32.gmra.mxu2 %v616_v30 }
 0x15d   :  { %v371_v36 = vpop.f32.mrf.mxu1 }
 0x15e   :  { %v372_v38 = vadd.f32 %v915_v50, %v371_v36 }
 0x160   :  { %449 = vst [vmem:[#allocation2 + $0x48] sm:$0xff] %v372_v38  ;;  %418 = vmatmul.f32.gmra.mxu2 %v620_v37 }
 0x165   :  { %v374_v41 = vpop.f32.mrf.mxu1 }
 0x166   :  { %v375_v42 = vadd.f32 %v915_v50, %v374_v41 }
 0x168   :  { %450 = vst [vmem:[#allocation2 + $0x50] sm:$0xff] %v375_v42  ;;  %421 = vmatmul.f32.gmra.mxu2 %v624_v43 }
 0x16d   :  { %v377_v45 = vpop.f32.mrf.mxu1 }
 0x16e   :  { %v378_v47 = vadd.f32 %v915_v50, %v377_v45 }
 0x170   :  { %451 = vst [vmem:[#allocation2 + $0x58] sm:$0xff] %v378_v47  ;;  %424 = vmatmul.f32.gmra.mxu2 %v626_v48 }
 0x175   :  { %v380_v51 = vpop.f32.mrf.mxu1 }
 0x176   :  { %v381_v52 = vadd.f32 %v915_v50, %v380_v51 }
 0x178   :  { %452 = vst [vmem:[#allocation2 + $0x60] sm:$0xff] %v381_v52  ;;  %427 = vmatmul.f32.gmra.mxu2 %v628_v53 }
 0x17d   :  { %v383_v54 = vpop.f32.mrf.mxu1 }
 0x17e   :  { %v384_v55 = vadd.f32 %v915_v50, %v383_v54 }
 0x180   :  { %453 = vst [vmem:[#allocation2 + $0x68] sm:$0xff] %v384_v55  ;;  %430 = vmatmul.f32.gmra.mxu2 %v630_v56 }
 0x185   :  { %v386_v57 = vpop.f32.mrf.mxu1 }
 0x186   :  { %v387_v58 = vadd.f32 %v915_v50, %v386_v57 }
 0x188   :  { %454 = vst [vmem:[#allocation2 + $0x70] sm:$0xff] %v387_v58 }
 0x193   :  { %v389_v59 = vpop.f32.mrf.mxu2 }
 0x194   :  { %v390_v46 = vadd.f32 %v915_v50, %v389_v59 }
 0x196   :  { %455 = vst [vmem:[#allocation2 + $0x78] sm:$0xff] %v390_v46 }
 0x19b   :  { %v392_v60 = vpop.f32.mrf.mxu2 }
 0x19c   :  { %v393_v61 = vadd.f32 %v915_v50, %v392_v60 }
 0x19e   :  { %456 = vst [vmem:[#allocation2 + $0x80] sm:$0xff] %v393_v61 }
 0x1a3   :  { %v395_v62 = vpop.f32.mrf.mxu2 }
 0x1a4   :  { %v396_v63 = vadd.f32 %v915_v50, %v395_v62  ;;  %v434_v13 = vpop.f32.mrf.mxu3 }
 0x1a5   :  { %v435_v15 = vadd.f32 %v915_v50, %v434_v13 }
 0x1a6   :  { %457 = vst [vmem:[#allocation2 + $0x88] sm:$0xff] %v396_v63 }
 0x1a7   :  { %470 = vst [vmem:[#allocation2 + $0xf0] sm:$0xff] %v435_v15 }
 0x1ab   :  { %v398_v0 = vpop.f32.mrf.mxu2 }
 0x1ac   :  { %v399_v1 = vadd.f32 %v915_v50, %v398_v0  ;;  %v437_v17 = vpop.f32.mrf.mxu3 }
 0x1ad   :  { %v438_v19 = vadd.f32 %v915_v50, %v437_v17 }
 0x1ae   :  { %458 = vst [vmem:[#allocation2 + $0x90] sm:$0xff] %v399_v1 }
 0x1af   :  { %471 = vst [vmem:[#allocation2 + $0xf8] sm:$0xff] %v438_v19 }
 0x1b3   :  { %v401_v2 = vpop.f32.mrf.mxu2 }
 0x1b4   :  { %v402_v3 = vadd.f32 %v915_v50, %v401_v2 }
 0x1b6   :  { %459 = vst [vmem:[#allocation2 + $0x98] sm:$0xff] %v402_v3 }
 0x1bb   :  { %v404_v4 = vpop.f32.mrf.mxu2 }
 0x1bc   :  { %v405_v5 = vadd.f32 %v915_v50, %v404_v4 }
 0x1be   :  { %460 = vst [vmem:[#allocation2 + $0xa0] sm:$0xff] %v405_v5 }
 0x1c3   :  { %v407_v6 = vpop.f32.mrf.mxu2 }
 0x1c4   :  { %v408_v7 = vadd.f32 %v915_v50, %v407_v6 }
 0x1c6   :  { %461 = vst [vmem:[#allocation2 + $0xa8] sm:$0xff] %v408_v7 }
 0x1cb   :  { %v410_v8 = vpop.f32.mrf.mxu2 }
 0x1cc   :  { %v411_v9 = vadd.f32 %v915_v50, %v410_v8 }
 0x1ce   :  { %462 = vst [vmem:[#allocation2 + $0xb0] sm:$0xff] %v411_v9 }
 0x1d3   :  { %v413_v10 = vpop.f32.mrf.mxu2 }
 0x1d4   :  { %v414_v11 = vadd.f32 %v915_v50, %v413_v10 }
 0x1d6   :  { %463 = vst [vmem:[#allocation2 + $0xb8] sm:$0xff] %v414_v11 }
 0x1db   :  { %v416_v12 = vpop.f32.mrf.mxu2 }
 0x1dc   :  { %v417_v14 = vadd.f32 %v915_v50, %v416_v12 }
 0x1de   :  { %464 = vst [vmem:[#allocation2 + $0xc0] sm:$0xff] %v417_v14 }
 0x1e3   :  { %v419_v16 = vpop.f32.mrf.mxu2 }
 0x1e4   :  { %v420_v18 = vadd.f32 %v915_v50, %v419_v16 }
 0x1e6   :  { %465 = vst [vmem:[#allocation2 + $0xc8] sm:$0xff] %v420_v18 }
 0x1eb   :  { %v422_v20 = vpop.f32.mrf.mxu2 }
 0x1ec   :  { %v423_v21 = vadd.f32 %v915_v50, %v422_v20 }
 0x1ee   :  { %466 = vst [vmem:[#allocation2 + $0xd0] sm:$0xff] %v423_v21 }
 0x1f3   :  { %v425_v22 = vpop.f32.mrf.mxu2 }
 0x1f4   :  { %v426_v23 = vadd.f32 %v915_v50, %v425_v22 }
 0x1f6   :  { %467 = vst [vmem:[#allocation2 + $0xd8] sm:$0xff] %v426_v23 }
 0x1fb   :  { %v428_v24 = vpop.f32.mrf.mxu2 }
 0x1fc   :  { %v429_v25 = vadd.f32 %v915_v50, %v428_v24 }
 0x1fe   :  { %468 = vst [vmem:[#allocation2 + $0xe0] sm:$0xff] %v429_v25 }
 0x203   :  { %v431_v26 = vpop.f32.mrf.mxu2 }
 0x204   :  { %v432_v27 = vadd.f32 %v915_v50, %v431_v26 }
 0x206   :  { %469 = vst [vmem:[#allocation2 + $0xe8] sm:$0xff] %v432_v27 }
 0x207   :  { %484 = dma.vmem_to_hbm [thread:$0]  %s477_s26, 4096, %s479_s29, [#allocation3], %s658_s30, %s658_s30, %s659_s6  }
 0x208   :  { %655 = dma.done.wait [#allocation3], 4096  }
 0x209   :  { %656 = vsyncadd [#allocation3], 4294963200 }
 0x20a   :  { %489 = vsyncpa [#allocation3], 1 }

</bundles_post_ra>
